<compile_context>
chip_gen: v7x
topology: tpu7x:2x2x1
jax: 0.10.0
libtpu: 0.0.40
codegen_flags: <defaults>
</compile_context>

<pallas_src>
import jax
import jax.numpy as jnp
from jax.experimental import pallas as pl
from jax.experimental.pallas import tpu as pltpu


def _stacked_kernel(x_ref, wf_ref, bf_ref, out_ref):
    """One batch tile: out = x @ W_fused + b_fused  (single MXU GEMM).

    x_ref  : [TB, CHW]   streamed input tile (f32 or bf16)
    wf_ref : [CHW, NCP]  fused (GAP * colleague * meta) weight, lane-padded
    bf_ref : [1, NCP]    fused bias (f32), lane-padded
    out_ref: [TB, NCP]   padded logits (f32)
    """
    out_ref[...] = (
        jnp.dot(x_ref[...], wf_ref[...], preferred_element_type=jnp.float32)
        + bf_ref[...]
    ).astype(out_ref.dtype)


def _round_up(a, m):
    return ((a + m - 1) // m) * m


def stacked_model_forward(x, colleague_w, colleague_b, meta_w, meta_b, *,
                          block_b=2048):
    """Forward pass of StackedModel.

    x           : [B, C, H, W]  (NCHW)
    colleague_w : [K, C, NC]    per-colleague head weight (math [in, out] layout)
    colleague_b : [K, NC]
    meta_w      : [K*NC, NC]    meta nn.Linear weight in math [in, out] layout
                                (i.e. the TRANSPOSE of PyTorch's [out, in] tensor)
    meta_b      : [NC]
    Returns [B, NC] float32 logits.
    """
    B, C, H, W = x.shape
    K, Cw, NC = colleague_w.shape
    assert Cw == C
    assert colleague_b.shape == (K, NC)
    assert meta_w.shape == (K * NC, NC), "meta_w must be math [in, out] layout"
    assert meta_b.shape == (NC,)

    HW = H * W
    CHW = C * HW
    NCP = _round_up(NC, 128)          # lane-dense output (unmasked full-width stores)

    # Lane-dense input layout (pure reshape; no data movement in the kernel).
    x2 = x.reshape(B, CHW)
    itemsize = x2.dtype.itemsize

    # ---- Static weight fusion (all math in f32; cast only the final result) ----
    #   colleague_k(x) = GAP(x) @ cw_k + cb_k ;  out = concat_k(.) @ mw + mb
    # With no nonlinearity in between this is exactly one affine map on x2.
    cw_all = jnp.transpose(colleague_w, (1, 0, 2)).reshape(C, K * NC).astype(jnp.float32)
    mw32 = meta_w.astype(jnp.float32)
    w_small = (cw_all / HW) @ mw32                                  # [C, NC]
    wf = jnp.repeat(w_small, HW, axis=0)                            # [CHW, NC]
    wf = jnp.pad(wf, ((0, 0), (0, NCP - NC))).astype(x2.dtype)      # [CHW, NCP]
    bf = (colleague_b.reshape(1, K * NC).astype(jnp.float32) @ mw32
          + meta_b.reshape(1, NC).astype(jnp.float32))              # [1, NC]
    bf = jnp.pad(bf, ((0, 0), (0, NCP - NC)))                       # [1, NCP], f32

    weight_bytes = CHW * NCP * itemsize + NCP * 4

    # VMEM budget: ~70% of physical per-core VMEM (v7x 64 MiB -> ~44 MiB,
    # v5e/v6e 128 MiB -> ~89 MiB).  Fall back to the tightest (v7x) figure.
    try:
        phys_vmem = int(pltpu.get_tpu_info().vmem_capacity_bytes)
    except Exception:
        phys_vmem = 64 * 1024 * 1024
    budget = int(phys_vmem * 0.7)

    # ---- Batch tile selection ----
    #  * multiple of the dtype sublane pack (unless it covers the whole batch)
    #  * at least 2 grid steps so "parallel" can use both v7x TensorCores
    #  * clamped so 3 x-buffers + 2 out-buffers + resident weights fit `budget`
    pack = {4: 8, 2: 16, 1: 32}.get(itemsize, 8)
    if B <= pack:
        tb = B
    else:
        tb = min(block_b, _round_up(pl.cdiv(B, 2), pack))
        tb = max(pack, (tb // pack) * pack)
        per_row = 3 * CHW * itemsize + 2 * NCP * 4
        avail = max(budget - weight_bytes - (4 << 20), per_row * pack)
        tb_max = max(pack, (avail // per_row) // pack * pack)
        tb = int(min(tb, tb_max))

    grid_steps = pl.cdiv(B, tb)
    grid = (grid_steps,)

    # Triple-buffer the streamed operand when there are enough steps: per-tile
    # compute is tiny vs the x DMA, so a third buffer hides the per-step
    # DMA-issue gap.  (Extra buffer is already accounted for in the budget.)
    x_spec_kwargs = {}
    if grid_steps >= 3:
        x_spec_kwargs["pipeline_mode"] = pl.Buffered(3)

    in_specs = [
        pl.BlockSpec((tb, CHW), lambda i: (i, 0), **x_spec_kwargs),  # streamed x
        pl.BlockSpec((CHW, NCP), lambda i: (0, 0)),                  # resident fused W
        pl.BlockSpec((1, NCP), lambda i: (0, 0)),                    # resident fused b
    ]

    flops = 2 * B * CHW * NCP
    bytes_accessed = B * CHW * itemsize + weight_bytes + B * NCP * 4

    # NOTE: when B % tb != 0 the final partial tile computes on out-of-bounds
    # rows that are masked on write -- safe for a pure affine map.
    out_padded = pl.pallas_call(
        _stacked_kernel,
        out_shape=jax.ShapeDtypeStruct((B, NCP), jnp.float32),
        grid=grid,
        in_specs=in_specs,
        out_specs=pl.BlockSpec((tb, NCP), lambda i: (i, 0)),
        compiler_params=pltpu.CompilerParams(
            dimension_semantics=("parallel",),
            vmem_limit_bytes=int(budget),
        ),
        cost_estimate=pl.CostEstimate(
            flops=int(flops), transcendentals=0,
            bytes_accessed=int(bytes_accessed)),
    )(x2, wf, bf)

    # Drop the lane padding (wrapper-side; kernel writeback stays lane-dense).
    return out_padded[:, :NC]


def _reference(x, colleague_w, colleague_b, meta_w, meta_b):
    B, C, H, W = x.shape
    K, _, NC = colleague_w.shape
    pooled = jnp.mean(x.reshape(B, C, H * W).astype(jnp.float32), axis=-1)   # [B, C]
    outs = [pooled @ colleague_w[k].astype(jnp.float32) + colleague_b[k]
            for k in range(K)]
    cat = jnp.concatenate(outs, axis=1)                                      # [B, K*NC]
    return cat @ meta_w.astype(jnp.float32) + meta_b                         # [B, NC]


if __name__ == "__main__":
    K, NC = 3, 10
    key = jax.random.PRNGKey(0)
    kx, kcw, kcb, kmw, kmb = jax.random.split(key, 5)

    # Small deterministic shapes consistent with the module (CIFAR-style input).
    B, C, H, W = 2, 4, 16, 16
    x = jax.random.normal(kx, (B, C, H, W), dtype=jnp.float32)
    colleague_w = 0.1 * jax.random.normal(kcw, (K, C, NC), dtype=jnp.float32)
    colleague_b = 0.1 * jax.random.normal(kcb, (K, NC), dtype=jnp.float32)
    meta_w = 0.1 * jax.random.normal(kmw, (K * NC, NC), dtype=jnp.float32)
    meta_b = 0.1 * jax.random.normal(kmb, (NC,), dtype=jnp.float32)

    out = jax.block_until_ready(
        stacked_model_forward(x, colleague_w, colleague_b, meta_w, meta_b))
    ref = _reference(x, colleague_w, colleague_b, meta_w, meta_b)
    assert out.shape == (B, NC)
    assert jnp.allclose(out, ref, atol=1e-4, rtol=1e-4), "f32 mismatch vs reference"

    # Multi-tile grid (exercises batch pipelining, Buffered(3), resident weights).
    B2 = 48
    x_big = jax.random.normal(jax.random.PRNGKey(1), (B2, C, H, W), dtype=jnp.float32)
    out2 = jax.block_until_ready(
        stacked_model_forward(x_big, colleague_w, colleague_b, meta_w, meta_b,
                              block_b=16))
    ref2 = _reference(x_big, colleague_w, colleague_b, meta_w, meta_b)
    assert out2.shape == (B2, NC)
    assert jnp.allclose(out2, ref2, atol=1e-4, rtol=1e-4), "tiled f32 mismatch"

    # bf16 input path (halves HBM traffic; f32 accumulation inside the kernel).
    out3 = jax.block_until_ready(
        stacked_model_forward(x_big.astype(jnp.bfloat16), colleague_w, colleague_b,
                              meta_w, meta_b, block_b=16))
    assert jnp.allclose(out3, ref2, atol=5e-2, rtol=5e-2), "bf16 mismatch"

    print("KERNEL_OK")
</pallas_src>

<mosaic_0001>
module attributes {stable_mosaic.version = 11 : i64} {
  func.func @_stacked_kernel(%arg0: i32, %arg1: memref<2x1024xf32, #tpu.memory_space<vmem>>, %arg2: memref<1024x128xf32, #tpu.memory_space<vmem>>, %arg3: memref<1x128xf32, #tpu.memory_space<vmem>>, %arg4: memref<2x128xf32, #tpu.memory_space<vmem>>) attributes {dimension_semantics = [#tpu.dimension_semantics<parallel>], iteration_bounds = array<i64: 1>, scalar_prefetch = 0 : i64, scratch_operands = 0 : i64, tpu.core_type = #tpu.core_type<tc>, window_params = [{transform_indices = @transform_0, window_bounds = array<i64: 2, 1024>}, {pipeline_mode = #tpu.pipeline_mode<synchronous>, transform_indices = @transform_1, window_bounds = array<i64: 1024, 128>}, {pipeline_mode = #tpu.pipeline_mode<synchronous>, transform_indices = @transform_2, window_bounds = array<i64: 1, 128>}, {transform_indices = @transform_3, window_bounds = array<i64: 2, 128>}]} {
    %c0 = arith.constant 0 : index
    %c0_0 = arith.constant 0 : index
    %0 = vector.load %arg1[%c0, %c0_0] : memref<2x1024xf32, #tpu.memory_space<vmem>>, vector<2x1024xf32>
    %c0_1 = arith.constant 0 : index
    %c0_2 = arith.constant 0 : index
    %1 = vector.load %arg2[%c0_1, %c0_2] : memref<1024x128xf32, #tpu.memory_space<vmem>>, vector<1024x128xf32>
    %cst = arith.constant dense<0.000000e+00> : vector<2x128xf32>
    %2 = tpu.matmul %0, %1, %cst {dimension_numbers = #tpu.dot_dimension_numbers<[1], [0], [0], [1], [0, 0, 1, 1], [], []>} : vector<2x1024xf32>, vector<1024x128xf32>, vector<2x128xf32> -> vector<2x128xf32>
    %c0_3 = arith.constant 0 : index
    %c0_4 = arith.constant 0 : index
    %3 = vector.load %arg3[%c0_3, %c0_4] : memref<1x128xf32, #tpu.memory_space<vmem>>, vector<1x128xf32>
    %4 = vector.broadcast %3 : vector<1x128xf32> to vector<2x128xf32>
    %5 = arith.addf %2, %4 : vector<2x128xf32>
    %c0_5 = arith.constant 0 : index
    %c0_6 = arith.constant 0 : index
    %6 = vector.load %arg4[%c0_5, %c0_6] : memref<2x128xf32, #tpu.memory_space<vmem>>, vector<2x128xf32>
    tpu.vector_store %arg4[%c0_5, %c0_6], %5 {strides = array<i32>} : memref<2x128xf32, #tpu.memory_space<vmem>>, vector<2x128xf32>,
    return
  }
  func.func @transform_0(%arg0: i32) -> (i32, i32) {
    %c0_i32 = arith.constant 0 : i32
    %c0_i32_0 = arith.constant 0 : i32
    return %arg0, %c0_i32 : i32, i32
  }
  func.func @transform_1(%arg0: i32) -> (i32, i32) {
    %c0_i32 = arith.constant 0 : i32
    %c0_i32_0 = arith.constant 0 : i32
    %c0_i32_1 = arith.constant 0 : i32
    return %c0_i32, %c0_i32_0 : i32, i32
  }
  func.func @transform_2(%arg0: i32) -> (i32, i32) {
    %c0_i32 = arith.constant 0 : i32
    %c0_i32_0 = arith.constant 0 : i32
    %c0_i32_1 = arith.constant 0 : i32
    return %c0_i32, %c0_i32_0 : i32, i32
  }
  func.func @transform_3(%arg0: i32) -> (i32, i32) {
    %c0_i32 = arith.constant 0 : i32
    %c0_i32_0 = arith.constant 0 : i32
    return %arg0, %c0_i32 : i32, i32
  }
}

</mosaic_0001>

<bundles_post_ra>
// kernel: tpu_custom_call.1
= control target key start
LH: loop header
LB: loop body
LE: loop exit
PB: predicated region body
PF: predicated region fallthrough
CT: control target
= control target key end

     0   :  { %8 = vsyncpa [#allocation3], 0  ;;  %s951_s0 = inlined_call_operand.hbm [shape: f32[2,1024], index: 0, kind: input, shape index: {}]   ;;  %s952_s1 = inlined_call_operand.hbm [shape: f32[1024,128], index: 1, kind: input, shape index: {}]   ;;  %s953_s2 = inlined_call_operand.vmem [shape: f32[1,128], index: 2, kind: input, shape index: {}]   ;;  %s954_s3 = inlined_call_operand.hbm [shape: f32[2,128], index: 3, kind: output, shape index: {}]  }
   0x1   :  { %9 = vsyncpa [#allocation6], 0 }
   0x2   :  { %10 = vsyncpa [#allocation4], 0  ;;  %s868_s12 = smov [#allocation2]   ;;  %s869_s14 = smov [#allocation5]  }
   0x3   :  { %s17_s13 = sshll.u32 %s868_s12, 4  ;;  %s26_s15 = sshll.u32 %s869_s14, 4  ;;  %s18_s13 = int_to_ptr.vmem [resolvable:$true] %s17_s13  ;;  %s894_s15 = int_to_ptr.vmem [resolvable:$true] %s26_s15 }
   0x4   :  { %s796_s18 = scalar_lea.hbm %s951_s0, 256 }
   0x5   :  { %p797_p0 = scmp.ne.s32.totalorder %s951_s0, %s796_s18  ;;  %p800_p1 = scmp.lt.u32.totalorder %s796_s18, %s951_s0 }
   0x7   :  { %p802_p2 = pnand %p800_p1, %p797_p0 }
   0x9   :  { %805 = shalt.err (!%p802_p2)
}
   0xa   :  { %s806_s23 = scalar_lea.vmem %s18_s13, 256  ;;  %p811_p4 = scmp.lt.s32.totalorder %s18_s13, %s18_s13 }
   0xb   :  { %p807_p3 = scmp.ne.s32.totalorder %s18_s13, %s806_s23  ;;  %p812_p5 = scmp.lt.s32.totalorder %s806_s23, %s806_s23 }
   0xd   :  { %p813_p6 = por %p812_p5, %p811_p4 }
   0xf   :  { %p814_p7 = pnand %p813_p6, %p807_p3 }
  0x11   :  { %817 = shalt.err (!%p814_p7)
}
  0x12   :  { %20 = dma.hbm_to_vmem [thread:$0]  %s951_s0, 256, %s18_s13, [#allocation3]  }
  0x13   :  { %s818_s28 = scalar_lea.hbm %s952_s1, 16384 }
  0x14   :  { %p819_p8 = scmp.ne.s32.totalorder %s952_s1, %s818_s28  ;;  %p822_p9 = scmp.lt.u32.totalorder %s818_s28, %s952_s1 }
  0x16   :  { %p824_p10 = pnand %p822_p9, %p819_p8 }
  0x18   :  { %827 = shalt.err (!%p824_p10)
}
  0x19   :  { %s828_s6 = scalar_lea.vmem %s894_s15, 16384  ;;  %p833_p12 = scmp.lt.s32.totalorder %s894_s15, %s894_s15 }
  0x1a   :  { %p829_p11 = scmp.ne.s32.totalorder %s894_s15, %s828_s6  ;;  %p834_p13 = scmp.lt.s32.totalorder %s828_s6, %s828_s6 }
  0x1c   :  { %p835_p0 = por %p834_p13, %p833_p12 }
  0x1e   :  { %p836_p1 = pnand %p835_p0, %p829_p11 }
  0x20   :  { %839 = shalt.err (!%p836_p1)
}
  0x21   :  { %s870_s0 = smov 128   ;;  %s871_s7 = smov 8  }
  0x22   :  { %32 = dma.hbm_to_vmem [thread:$0]  %s952_s1, 16384, %s894_s15, [#allocation6], %s870_s0, %s870_s0, %s871_s7  }
  0x23   :  { %862 = dma.done.wait [#allocation3], 256  }
  0x24   :  { %863 = vsyncadd [#allocation3], 4294967040 }
  0x25   :  { %864 = dma.done.wait [#allocation6], 16384  }
  0x26   :  { %865 = vsyncadd [#allocation6], 4294950912  ;;  %v59_v0 = vld [vmem:[#allocation5 + $0x80] sm:$0xff]  ;;  %v60_v1 = vld [vmem:[#allocation5 + $0x88] sm:$0xff]  ;;  %v872_v47 = vmov 1983009808   ;;  %v184_v49 = vlaneseq }
  0x27   :  { %v43_v2 = vld [vmem:[#allocation5] sm:$0xff]  ;;  %v660_v3 = vpack.c.bf16 %v60_v1, %v59_v0  ;;  %v44_v4 = vld [vmem:[#allocation5 + $0x8] sm:$0xff]  ;;  %v61_v11 = vld [vmem:[#allocation5 + $0x90] sm:$0xff]  ;;  %v182_v48 = vunpack.c.l.s4 %v872_v47  ;;  %s873_s11 = smov [#allocation7]  }
  0x28   :  { %v91_v5 = vld [vmem:[#allocation5 + $0x180] sm:$0xff]  ;;  %v92_v6 = vld [vmem:[#allocation5 + $0x188] sm:$0xff]  ;;  %v662_v7 = vpack.c.bf16 %v44_v4, %v43_v2  ;;  %v62_v13 = vld [vmem:[#allocation5 + $0x98] sm:$0xff]  ;;  %v185_v0 = vshrl.u32 %v184_v49, 7  ;;  %s509_s12 = sshll.u32 %s873_s11, 4  ;;  %s510_s12 = int_to_ptr.vmem [resolvable:$true] %s509_s12 }
  0x29   :  { %v692_v8 = vpack.c.bf16 %v92_v6, %v91_v5  ;;  %v75_v9 = vld [vmem:[#allocation5 + $0x100] sm:$0xff]  ;;  %v76_v10 = vld [vmem:[#allocation5 + $0x108] sm:$0xff]  ;;  %661 = vmatprep.subr.bf16.mxu0 %v660_v3  ;;  %v45_v14 = vld [vmem:[#allocation5 + $0x10] sm:$0xff]  ;;  %v664_v16 = vpack.c.bf16 %v62_v13, %v61_v11  ;;  %v183_v63 = vunpack.c.0.s8 %v182_v48  ;;  %p845_p3 = scmp.lt.s32.totalorder %s510_s12, %s510_s12 }
  0x2a   :  { %v694_v12 = vpack.c.bf16 %v76_v10, %v75_v9  ;;  %v46_v15 = vld [vmem:[#allocation5 + $0x18] sm:$0xff]  ;;  %663 = vmatpush3.bf16.msra.mxu0 %v662_v7  ;;  %v93_v18 = vld [vmem:[#allocation5 + $0x190] sm:$0xff]  ;;  %v63_v23 = vld [vmem:[#allocation5 + $0xa0] sm:$0xff] }
  0x2b   :  { %693 = vmatprep.subr.bf16.mxu1 %v692_v8  ;;  %v666_v17 = vpack.c.bf16 %v46_v15, %v45_v14  ;;  %v94_v19 = vld [vmem:[#allocation5 + $0x198] sm:$0xff]  ;;  %v77_v20 = vld [vmem:[#allocation5 + $0x110] sm:$0xff]  ;;  %v64_v24 = vld [vmem:[#allocation5 + $0xa8] sm:$0xff]  ;;  %665 = vmatprep.subr.bf16.mxu0 %v664_v16  ;;  %v925_v13 = vsub.s32 %v183_v63, %v185_v0 }
  0x2c   :  { %695 = vmatpush3.bf16.msra.mxu1 %v694_v12  ;;  %v696_v21 = vpack.c.bf16 %v94_v19, %v93_v18  ;;  %v78_v22 = vld [vmem:[#allocation5 + $0x118] sm:$0xff]  ;;  %v668_v26 = vpack.c.bf16 %v64_v24, %v63_v23  ;;  %v47_v27 = vld [vmem:[#allocation5 + $0x20] sm:$0xff]  ;;  %v48_v28 = vld [vmem:[#allocation5 + $0x28] sm:$0xff] }
  0x2d   :  { %v698_v25 = vpack.c.bf16 %v78_v22, %v77_v20  ;;  %v95_v29 = vld [vmem:[#allocation5 + $0x1a0] sm:$0xff]  ;;  %v96_v30 = vld [vmem:[#allocation5 + $0x1a8] sm:$0xff]  ;;  %v670_v33 = vpack.c.bf16 %v48_v28, %v47_v27  ;;  %v65_v35 = vld [vmem:[#allocation5 + $0xb0] sm:$0xff] }
  0x2e   :  { %697 = vmatprep.subr.bf16.mxu1 %v696_v21  ;;  %v79_v31 = vld [vmem:[#allocation5 + $0x120] sm:$0xff]  ;;  %v80_v32 = vld [vmem:[#allocation5 + $0x128] sm:$0xff]  ;;  %667 = vmatpush3.bf16.msra.mxu0 %v666_v17  ;;  %v700_v34 = vpack.c.bf16 %v96_v30, %v95_v29  ;;  %v66_v36 = vld [vmem:[#allocation5 + $0xb8] sm:$0xff] }
  0x2f   :  { %v49_v37 = vld [vmem:[#allocation5 + $0x30] sm:$0xff]  ;;  %669 = vmatprep.subr.bf16.mxu0 %v668_v26  ;;  %v702_v38 = vpack.c.bf16 %v80_v32, %v79_v31  ;;  %v672_v39 = vpack.c.bf16 %v66_v36, %v65_v35  ;;  %v50_v40 = vld [vmem:[#allocation5 + $0x38] sm:$0xff]  ;;  %v67_v46 = vld [vmem:[#allocation5 + $0xc0] sm:$0xff] }
  0x30   :  { %699 = vmatpush3.bf16.msra.mxu1 %v698_v25  ;;  %v97_v41 = vld [vmem:[#allocation5 + $0x1b0] sm:$0xff]  ;;  %v98_v42 = vld [vmem:[#allocation5 + $0x1b8] sm:$0xff]  ;;  %v68_v50 = vld [vmem:[#allocation5 + $0xc8] sm:$0xff]  ;;  %v674_v51 = vpack.c.bf16 %v50_v40, %v49_v37 }
  0x31   :  { %701 = vmatprep.subr.bf16.mxu1 %v700_v34  ;;  %v704_v43 = vpack.c.bf16 %v98_v42, %v97_v41  ;;  %v81_v44 = vld [vmem:[#allocation5 + $0x130] sm:$0xff]  ;;  %v82_v45 = vld [vmem:[#allocation5 + $0x138] sm:$0xff]  ;;  %v99_v52 = vld [vmem:[#allocation5 + $0x1c0] sm:$0xff]  ;;  %v676_v55 = vpack.c.bf16 %v68_v50, %v67_v46 }
  0x32   :  { %671 = vmatpush3.bf16.msra.mxu0 %v670_v33  ;;  %v100_v53 = vld [vmem:[#allocation5 + $0x1c8] sm:$0xff]  ;;  %v706_v54 = vpack.c.bf16 %v82_v45, %v81_v44  ;;  %v51_v56 = vld [vmem:[#allocation5 + $0x40] sm:$0xff]  ;;  %v69_v61 = vld [vmem:[#allocation5 + $0xd0] sm:$0xff] }
  0x33   :  { %673 = vmatprep.subr.bf16.mxu0 %v672_v39  ;;  %v52_v57 = vld [vmem:[#allocation5 + $0x48] sm:$0xff]  ;;  %v83_v58 = vld [vmem:[#allocation5 + $0x140] sm:$0xff]  ;;  %v708_v59 = vpack.c.bf16 %v100_v53, %v99_v52  ;;  %v70_v62 = vld [vmem:[#allocation5 + $0xd8] sm:$0xff] }
  0x34   :  { %703 = vmatpush3.bf16.msra.mxu1 %v702_v38  ;;  %v84_v60 = vld [vmem:[#allocation5 + $0x148] sm:$0xff]  ;;  %v101_v1 = vld [vmem:[#allocation5 + $0x1d0] sm:$0xff]  ;;  %v102_v2 = vld [vmem:[#allocation5 + $0x1d8] sm:$0xff]  ;;  %v678_v3 = vpack.c.bf16 %v52_v57, %v51_v56  ;;  %v680_v5 = vpack.c.bf16 %v70_v62, %v69_v61 }
  0x35   :  { %705 = vmatprep.subr.bf16.mxu1 %v704_v43  ;;  %v710_v4 = vpack.c.bf16 %v84_v60, %v83_v58  ;;  %v53_v6 = vld [vmem:[#allocation5 + $0x50] sm:$0xff]  ;;  %v54_v7 = vld [vmem:[#allocation5 + $0x58] sm:$0xff]  ;;  %v712_v9 = vpack.c.bf16 %v102_v2, %v101_v1  ;;  %v71_v11 = vld [vmem:[#allocation5 + $0xe0] sm:$0xff] }
  0x36   :  { %675 = vmatpush3.bf16.msra.mxu0 %v674_v51  ;;  %v85_v8 = vld [vmem:[#allocation5 + $0x150] sm:$0xff]  ;;  %v86_v10 = vld [vmem:[#allocation5 + $0x158] sm:$0xff]  ;;  %v72_v12 = vld [vmem:[#allocation5 + $0xe8] sm:$0xff]  ;;  %v682_v16 = vpack.c.bf16 %v54_v7, %v53_v6 }
  0x37   :  { %677 = vmatprep.subr.bf16.mxu0 %v676_v55  ;;  %v103_v14 = vld [vmem:[#allocation5 + $0x1e0] sm:$0xff]  ;;  %v104_v15 = vld [vmem:[#allocation5 + $0x1e8] sm:$0xff]  ;;  %v714_v18 = vpack.c.bf16 %v86_v10, %v85_v8  ;;  %v684_v19 = vpack.c.bf16 %v72_v12, %v71_v11  ;;  %v41_v22 = vld [vmem:[#allocation2] sm:$0xff] }
  0x38   :  { %707 = vmatpush3.bf16.msra.mxu1 %v706_v54  ;;  %v55_v17 = vld [vmem:[#allocation5 + $0x60] sm:$0xff]  ;;  %v56_v20 = vld [vmem:[#allocation5 + $0x68] sm:$0xff]  ;;  %v716_v23 = vpack.c.bf16 %v104_v15, %v103_v14  ;;  %v73_v25 = vld [vmem:[#allocation5 + $0xf0] sm:$0xff]  ;;  %v187_v27 = vrot.slane %v41_v22, %v925_v13  ;;  %v180_v28 = vcombine.high %v41_v22, %v41_v22 }
  0x39   :  { %709 = vmatprep.subr.bf16.mxu1 %v708_v59  ;;  %v87_v21 = vld [vmem:[#allocation5 + $0x160] sm:$0xff]  ;;  %v88_v24 = vld [vmem:[#allocation5 + $0x168] sm:$0xff]  ;;  %v74_v26 = vld [vmem:[#allocation5 + $0xf8] sm:$0xff]  ;;  %v686_v31 = vpack.c.bf16 %v56_v20, %v55_v17 }
  0x3a   :  { %679 = vmatpush3.bf16.msra.mxu0 %v678_v3  ;;  %v105_v29 = vld [vmem:[#allocation5 + $0x1f0] sm:$0xff]  ;;  %v106_v30 = vld [vmem:[#allocation5 + $0x1f8] sm:$0xff]  ;;  %v195_v32 = vcombine.high %v187_v27, %v187_v27  ;;  %v194_v33 = vrot.slane %v180_v28, %v925_v13  ;;  %v718_v34 = vpack.c.bf16 %v88_v24, %v87_v21  ;;  %v688_v35 = vpack.c.bf16 %v74_v26, %v73_v25  ;;  %v123_v41 = vld [vmem:[#allocation5 + $0x280] sm:$0xff] }
  0x3b   :  { %681 = vmatprep.subr.bf16.mxu0 %v680_v5  ;;  %v57_v36 = vld [vmem:[#allocation5 + $0x70] sm:$0xff]  ;;  %v58_v37 = vld [vmem:[#allocation5 + $0x78] sm:$0xff]  ;;  %v720_v39 = vpack.c.bf16 %v106_v30, %v105_v29  ;;  %v124_v42 = vld [vmem:[#allocation5 + $0x288] sm:$0xff] }
  0x3c   :  { %711 = vmatpush3.bf16.msra.mxu1 %v710_v4  ;;  %v89_v38 = vld [vmem:[#allocation5 + $0x170] sm:$0xff]  ;;  %v90_v40 = vld [vmem:[#allocation5 + $0x178] sm:$0xff]  ;;  %286 = vmatprep.mubr.f32.mxu0 %v195_v32  ;;  %v196_v43 = vcombine.high %v194_v33, %v194_v33  ;;  %v155_v44 = vld [vmem:[#allocation5 + $0x380] sm:$0xff]  ;;  %v690_v46 = vpack.c.bf16 %v58_v37, %v57_v36  ;;  %v724_v48 = vpack.c.bf16 %v124_v42, %v123_v41 }
  0x3d   :  { %713 = vmatprep.subr.bf16.mxu1 %v712_v9  ;;  %v156_v45 = vld [vmem:[#allocation5 + $0x388] sm:$0xff]  ;;  %v722_v47 = vpack.c.bf16 %v90_v40, %v89_v38  ;;  %v107_v49 = vld [vmem:[#allocation5 + $0x200] sm:$0xff]  ;;  %v125_v54 = vld [vmem:[#allocation5 + $0x290] sm:$0xff] }
  0x3e   :  { %683 = vmatpush3.bf16.msra.mxu0 %v682_v16  ;;  %356 = vmatprep.mubr.f32.mxu1 %v196_v43  ;;  %v108_v50 = vld [vmem:[#allocation5 + $0x208] sm:$0xff]  ;;  %v139_v51 = vld [vmem:[#allocation5 + $0x300] sm:$0xff]  ;;  %v756_v52 = vpack.c.bf16 %v156_v45, %v155_v44  ;;  %v126_v55 = vld [vmem:[#allocation5 + $0x298] sm:$0xff] }
  0x3f   :  { %685 = vmatprep.subr.bf16.mxu0 %v684_v19  ;;  %v140_v53 = vld [vmem:[#allocation5 + $0x308] sm:$0xff]  ;;  %v157_v56 = vld [vmem:[#allocation5 + $0x390] sm:$0xff]  ;;  %v158_v57 = vld [vmem:[#allocation5 + $0x398] sm:$0xff]  ;;  %v726_v58 = vpack.c.bf16 %v108_v50, %v107_v49  ;;  %v728_v60 = vpack.c.bf16 %v126_v55, %v125_v54 }
  0x40   :  { %715 = vmatpush3.bf16.msra.mxu1 %v714_v18  ;;  %v758_v59 = vpack.c.bf16 %v140_v53, %v139_v51  ;;  %v109_v61 = vld [vmem:[#allocation5 + $0x210] sm:$0xff]  ;;  %v110_v62 = vld [vmem:[#allocation5 + $0x218] sm:$0xff]  ;;  %v760_v0 = vpack.c.bf16 %v158_v57, %v157_v56  ;;  %v127_v2 = vld [vmem:[#allocation5 + $0x2a0] sm:$0xff] }
  0x41   :  { %717 = vmatprep.subr.bf16.mxu1 %v716_v23  ;;  %v141_v63 = vld [vmem:[#allocation5 + $0x310] sm:$0xff]  ;;  %v142_v1 = vld [vmem:[#allocation5 + $0x318] sm:$0xff]  ;;  %v128_v3 = vld [vmem:[#allocation5 + $0x2a8] sm:$0xff]  ;;  %v730_v6 = vpack.c.bf16 %v110_v62, %v109_v61 }
  0x42   :  { %687 = vmatpush3.bf16.msra.mxu0 %v686_v31  ;;  %v159_v4 = vld [vmem:[#allocation5 + $0x3a0] sm:$0xff]  ;;  %v160_v5 = vld [vmem:[#allocation5 + $0x3a8] sm:$0xff]  ;;  %v762_v7 = vpack.c.bf16 %v142_v1, %v141_v63  ;;  %v732_v8 = vpack.c.bf16 %v128_v3, %v127_v2  ;;  %v129_v15 = vld [vmem:[#allocation5 + $0x2b0] sm:$0xff] }
  0x43   :  { %689 = vmatprep.subr.bf16.mxu0 %v688_v35  ;;  %v111_v9 = vld [vmem:[#allocation5 + $0x220] sm:$0xff]  ;;  %v112_v10 = vld [vmem:[#allocation5 + $0x228] sm:$0xff]  ;;  %v764_v12 = vpack.c.bf16 %v160_v5, %v159_v4  ;;  %v130_v16 = vld [vmem:[#allocation5 + $0x2b8] sm:$0xff] }
  0x44   :  { %719 = vmatpush3.bf16.msra.mxu1 %v718_v34  ;;  %v143_v11 = vld [vmem:[#allocation5 + $0x320] sm:$0xff]  ;;  %v144_v14 = vld [vmem:[#allocation5 + $0x328] sm:$0xff]  ;;  %v161_v17 = vld [vmem:[#allocation5 + $0x3b0] sm:$0xff]  ;;  %v734_v19 = vpack.c.bf16 %v112_v10, %v111_v9  ;;  %v736_v21 = vpack.c.bf16 %v130_v16, %v129_v15 }
  0x45   :  { %721 = vmatprep.subr.bf16.mxu1 %v720_v39  ;;  %v162_v18 = vld [vmem:[#allocation5 + $0x3b8] sm:$0xff]  ;;  %v766_v20 = vpack.c.bf16 %v144_v14, %v143_v11  ;;  %v113_v22 = vld [vmem:[#allocation5 + $0x230] sm:$0xff]  ;;  %v132_v28 = vld [vmem:[#allocation5 + $0x2c8] sm:$0xff] }
  0x46   :  { %691 = vmatpush3.bf16.msra.mxu0 %v690_v46  ;;  %v114_v23 = vld [vmem:[#allocation5 + $0x238] sm:$0xff]  ;;  %v145_v24 = vld [vmem:[#allocation5 + $0x330] sm:$0xff]  ;;  %v768_v25 = vpack.c.bf16 %v162_v18, %v161_v17  ;;  %v163_v29 = vld [vmem:[#allocation5 + $0x3c0] sm:$0xff] }
  0x47   :  { %725 = vmatprep.subr.bf16.mxu0 %v724_v48  ;;  %v146_v26 = vld [vmem:[#allocation5 + $0x338] sm:$0xff]  ;;  %v164_v30 = vld [vmem:[#allocation5 + $0x3c8] sm:$0xff]  ;;  %v738_v32 = vpack.c.bf16 %v114_v23, %v113_v22  ;;  %v115_v37 = vld [vmem:[#allocation5 + $0x240] sm:$0xff] }
  0x48   :  { %723 = vmatpush3.bf16.msra.mxu1 %v722_v47  ;;  %v42_v31 = vld [vmem:[#allocation2 + $0x8] sm:$0xff]  ;;  %v770_v35 = vpack.c.bf16 %v146_v26, %v145_v24  ;;  %v116_v38 = vld [vmem:[#allocation5 + $0x248] sm:$0xff]  ;;  %v147_v39 = vld [vmem:[#allocation5 + $0x340] sm:$0xff]  ;;  %v772_v40 = vpack.c.bf16 %v164_v30, %v163_v29 }
  0x49   :  { %757 = vmatprep.subr.bf16.mxu1 %v756_v52  ;;  %287 = vmatmul.mubr.f32.vlgmr.msra.gmra.mrb[0].mxu0 %v187_v27  ;;  %v131_v27 = vld [vmem:[#allocation5 + $0x2c0] sm:$0xff]  ;;  %v197_v34 = vcombine.high %v42_v31, %v42_v31  ;;  %v148_v41 = vld [vmem:[#allocation5 + $0x348] sm:$0xff]  ;;  %v133_v42 = vld [vmem:[#allocation5 + $0x2d0] sm:$0xff]  ;;  %v742_v48 = vpack.c.bf16 %v116_v38, %v115_v37 }
  0x4a   :  { %727 = vmatpush3.bf16.msra.mxu0 %v726_v58  ;;  %v740_v36 = vpack.c.bf16 %v132_v28, %v131_v27  ;;  %v134_v43 = vld [vmem:[#allocation5 + $0x2d8] sm:$0xff]  ;;  %v165_v46 = vld [vmem:[#allocation5 + $0x3d0] sm:$0xff]  ;;  %v774_v50 = vpack.c.bf16 %v148_v41, %v147_v39  ;;  %v135_v57 = vld [vmem:[#allocation5 + $0x2e0] sm:$0xff] }
  0x4b   :  { %357 = vmatmul.mubr.f32.vlgmr.msra.gmra.mrb[0].mxu1 %v194_v33  ;;  %729 = vmatprep.subr.bf16.mxu0 %v728_v60  ;;  %v930_v33 = vrot.slane %v42_v31, %v925_v13  ;;  %v211_v45 = vrot.slane %v197_v34, %v925_v13  ;;  %v166_v47 = vld [vmem:[#allocation5 + $0x3d8] sm:$0xff]  ;;  %v744_v51 = vpack.c.bf16 %v134_v43, %v133_v42  ;;  %v117_v52 = vld [vmem:[#allocation5 + $0x250] sm:$0xff]  ;;  %v136_v58 = vld [vmem:[#allocation5 + $0x2e8] sm:$0xff] }
  0x4c   :  { %759 = vmatpush3.bf16.msra.mxu1 %v758_v59  ;;  %v118_v53 = vld [vmem:[#allocation5 + $0x258] sm:$0xff]  ;;  %v149_v54 = vld [vmem:[#allocation5 + $0x350] sm:$0xff]  ;;  %v776_v55 = vpack.c.bf16 %v166_v47, %v165_v46  ;;  %v167_v13 = vld [vmem:[#allocation5 + $0x3e0] sm:$0xff]  ;;  %v748_v62 = vpack.c.bf16 %v136_v58, %v135_v57 }
  0x4d   :  { %761 = vmatprep.subr.bf16.mxu1 %v760_v0  ;;  %v212_v44 = vcombine.high %v930_v33, %v930_v33  ;;  %v213_v49 = vcombine.high %v211_v45, %v211_v45  ;;  %v150_v56 = vld [vmem:[#allocation5 + $0x358] sm:$0xff]  ;;  %v168_v59 = vld [vmem:[#allocation5 + $0x3e8] sm:$0xff]  ;;  %v746_v60 = vpack.c.bf16 %v118_v53, %v117_v52  ;;  %v119_v63 = vld [vmem:[#allocation5 + $0x260] sm:$0xff] }
  0x4e   :  { %731 = vmatpush3.bf16.msra.mxu0 %v730_v6  ;;  %v778_v61 = vpack.c.bf16 %v150_v56, %v149_v54  ;;  %v120_v0 = vld [vmem:[#allocation5 + $0x268] sm:$0xff]  ;;  %v151_v1 = vld [vmem:[#allocation5 + $0x360] sm:$0xff]  ;;  %v780_v2 = vpack.c.bf16 %v168_v59, %v167_v13  ;;  %v137_v4 = vld [vmem:[#allocation5 + $0x2f0] sm:$0xff] }
  0x4f   :  { %733 = vmatprep.subr.bf16.mxu0 %v732_v8  ;;  %426 = vmatprep.mubr.f32.mxu0 %v212_v44  ;;  %v152_v3 = vld [vmem:[#allocation5 + $0x368] sm:$0xff]  ;;  %v138_v5 = vld [vmem:[#allocation5 + $0x2f8] sm:$0xff]  ;;  %v169_v6 = vld [vmem:[#allocation5 + $0x3f0] sm:$0xff]  ;;  %v750_v8 = vpack.c.bf16 %v120_v0, %v119_v63 }
  0x50   :  { %763 = vmatpush3.bf16.msra.mxu1 %v762_v7  ;;  %496 = vmatprep.mubr.f32.mxu1 %v213_v49  ;;  %v170_v7 = vld [vmem:[#allocation5 + $0x3f8] sm:$0xff]  ;;  %v782_v9 = vpack.c.bf16 %v152_v3, %v151_v1  ;;  %v752_v10 = vpack.c.bf16 %v138_v5, %v137_v4  ;;  %v121_v11 = vld [vmem:[#allocation5 + $0x270] sm:$0xff] }
  0x51   :  { %765 = vmatprep.subr.bf16.mxu1 %v764_v12  ;;  %v122_v12 = vld [vmem:[#allocation5 + $0x278] sm:$0xff]  ;;  %v784_v14 = vpack.c.bf16 %v170_v7, %v169_v6  ;;  %v153_v15 = vld [vmem:[#allocation5 + $0x370] sm:$0xff] }
  0x52   :  { %735 = vmatpush3.bf16.msra.mxu0 %v734_v19  ;;  %v154_v16 = vld [vmem:[#allocation5 + $0x378] sm:$0xff]  ;;  %v754_v17 = vpack.c.bf16 %v122_v12, %v121_v11 }
  0x53   :  { %737 = vmatprep.subr.bf16.mxu0 %v736_v21  ;;  %v786_v18 = vpack.c.bf16 %v154_v16, %v153_v15 }
  0x54   :  { %767 = vmatpush3.bf16.msra.mxu1 %v766_v20  ;;  %v519_v20 = vld [vmem:[%s953_s2] ss:$0 sm:$0xff]  ;;  %s840_s2 = scalar_lea.vmem %s510_s12, 32 }
  0x55   :  { %769 = vmatprep.subr.bf16.mxu1 %v768_v25  ;;  %p841_p2 = scmp.ne.s32.totalorder %s510_s12, %s840_s2  ;;  %p846_p4 = scmp.lt.s32.totalorder %s840_s2, %s840_s2 }
  0x56   :  { %739 = vmatpush3.bf16.msra.mxu0 %v738_v32 }
  0x57   :  { %741 = vmatprep.subr.bf16.mxu0 %v740_v36  ;;  %p847_p5 = por %p846_p4, %p845_p3 }
  0x58   :  { %771 = vmatpush3.bf16.msra.mxu1 %v770_v35 }
  0x59   :  { %773 = vmatprep.subr.bf16.mxu1 %v772_v40  ;;  %p848_p6 = pnand %p847_p5, %p841_p2 }
  0x5a   :  { %743 = vmatpush3.bf16.msra.mxu0 %v742_v48 }
  0x5b   :  { %745 = vmatprep.subr.bf16.mxu0 %v744_v51 }
  0x5c   :  { %775 = vmatpush3.bf16.msra.mxu1 %v774_v50 }
  0x5d   :  { %777 = vmatprep.subr.bf16.mxu1 %v776_v55 }
  0x5e   :  { %747 = vmatpush3.bf16.msra.mxu0 %v746_v60 }
  0x5f   :  { %749 = vmatprep.subr.bf16.mxu0 %v748_v62 }
  0x60   :  { %779 = vmatpush3.bf16.msra.mxu1 %v778_v61 }
  0x61   :  { %781 = vmatprep.subr.bf16.mxu1 %v780_v2 }
  0x62   :  { %751 = vmatpush3.bf16.msra.mxu0 %v750_v8 }
  0x63   :  { %753 = vmatprep.subr.bf16.mxu0 %v752_v10 }
  0x64   :  { %783 = vmatpush3.bf16.msra.mxu1 %v782_v9 }
  0x65   :  { %785 = vmatprep.subr.bf16.mxu1 %v784_v14 }
  0x66   :  { %755 = vmatpush3.bf16.msra.mxu0 %v754_v17 }
  0x68   :  { %787 = vmatpush3.bf16.msra.mxu1 %v786_v18 }
  0x69   :  { %427 = vmatmul.mubr.f32.vlgmr.msra.gmra.mrb[2].mxu0 %v930_v33 }
  0x6b   :  { %497 = vmatmul.mubr.f32.vlgmr.msra.gmra.mrb[2].mxu1 %v211_v45 }
 0x11c   :  { %v552_v19 = vpop.f32.mrb[0].mxu0 }
 0x11d   :  { %v553_v21 = vpop.f32.mrb[1].mxu0 }
 0x11e   :  { %v587_v22 = vpop.f32.mrb[0].mxu1  ;;  %v554_v23 = vadd.f32 %v553_v21, %v552_v19 }
 0x11f   :  { %v588_v24 = vpop.f32.mrb[1].mxu1 }
 0x120   :  { %v589_v25 = vadd.f32 %v588_v24, %v587_v22  ;;  %v289_v26 = vadd.f32 %v554_v23, %v519_v20 }
 0x122   :  { %v359_v27 = vadd.f32 %v589_v25, %v289_v26 }
 0x13c   :  { %v622_v28 = vpop.f32.mrb[2].mxu0 }
 0x13d   :  { %v623_v29 = vpop.f32.mrb[3].mxu0 }
 0x13e   :  { %v657_v30 = vpop.f32.mrb[2].mxu1  ;;  %v624_v31 = vadd.f32 %v623_v29, %v622_v28 }
 0x13f   :  { %v658_v32 = vpop.f32.mrb[3].mxu1 }
 0x140   :  { %v659_v34 = vadd.f32 %v658_v32, %v657_v30  ;;  %v429_v33 = vadd.f32 %v624_v31, %v359_v27 }
 0x142   :  { %v499_v35 = vadd.f32 %v659_v34, %v429_v33 }
 0x144   :  { %502 = vst [vmem:[#allocation7] sm:$0x3] %v499_v35 }
 0x145   :  { %851 = shalt.err (!%p848_p6)
}
 0x146   :  { %s852_s15 = scalar_lea.hbm %s954_s3, 32 }
 0x147   :  { %p853_p7 = scmp.ne.s32.totalorder %s954_s3, %s852_s15  ;;  %p856_p8 = scmp.lt.u32.totalorder %s852_s15, %s954_s3 }
 0x149   :  { %p858_p9 = pnand %p856_p8, %p853_p7 }
 0x14b   :  { %861 = shalt.err (!%p858_p9)
}
 0x14c   :  { %512 = dma.vmem_to_hbm [thread:$0]  %s510_s12, 32, %s954_s3, [#allocation4]  }
 0x14d   :  { %866 = dma.done.wait [#allocation4], 32  }
 0x14e   :  { %867 = vsyncadd [#allocation4], 4294967264 }
 0x14f   :  { %516 = vsyncpa [#allocation3], 1 }
 0x150   :  { %517 = vsyncpa [#allocation6], 1 }
 0x151   :  { %518 = vsyncpa [#allocation4], 1 }

</bundles_post_ra>
